<compile_context>
chip_gen: v7x
topology: tpu7x:2x2x1
jax: 0.10.0
libtpu: 0.0.40
codegen_flags: <defaults>
</compile_context>

<pallas_src>
import math

import jax
import jax.numpy as jnp
from jax.experimental import pallas as pl
from jax.experimental.pallas import tpu as pltpu

_MiB = 1024 * 1024


def _round_up(x, m):
    return (x + m - 1) // m * m


def _nbytes(shape, dtype):
    return math.prod(shape) * jnp.dtype(dtype).itemsize


# ---------------------------------------------------------------------------
# Kernels
# ---------------------------------------------------------------------------
def mlp_fused_kernel(x_ref, w1_ref, b1_ref, w2_ref, b2_ref, o_ref):
    """Whole MLP per batch tile; weights fully resident in VMEM."""
    # hidden_1: MXU matmul with f32 accumulation, bias + ReLU in f32 (VPU).
    h = jnp.dot(x_ref[...], w1_ref[...], preferred_element_type=jnp.float32)
    h = jnp.maximum(h + b1_ref[...], 0.0)
    # hidden_2: cast activations to the matmul operand dtype (accumulation stays f32).
    out = jnp.dot(h.astype(w2_ref.dtype), w2_ref[...],
                  preferred_element_type=jnp.float32)
    o_ref[...] = (out + b2_ref[...]).astype(o_ref.dtype)


def mlp_tiled_kernel(x_ref, w1_ref, b1_ref, w2_ref, b2_ref, o_ref, acc_ref):
    """Hidden-dim tiled fallback: grid axis 1 walks D_h; acc_ref is the f32
    accumulator for the second matmul (output block is resident across axis 1)."""
    kh = pl.program_id(1)

    @pl.when(kh == 0)
    def _():
        acc_ref[...] = jnp.zeros_like(acc_ref)

    # Partial hidden slice: x @ w1[:, kh_tile] + b1[kh_tile], ReLU.
    h = jnp.dot(x_ref[...], w1_ref[...], preferred_element_type=jnp.float32)
    h = jnp.maximum(h + b1_ref[...], 0.0)
    acc_ref[...] += jnp.dot(h.astype(w2_ref.dtype), w2_ref[...],
                            preferred_element_type=jnp.float32)

    @pl.when(kh == pl.num_programs(1) - 1)
    def _():
        o_ref[...] = (acc_ref[...] + b2_ref[...]).astype(o_ref.dtype)


# ---------------------------------------------------------------------------
# Sizing helpers
# ---------------------------------------------------------------------------
def _vmem_budget_bytes():
    """Per-generation VMEM budget with headroom for Mosaic internal scratch."""
    try:
        cap = int(pltpu.get_tpu_info().vmem_capacity_bytes)
    except Exception:
        cap = 64 * _MiB  # conservative (v7x-sized) default
    if cap <= 64 * _MiB:
        budget = cap - 8 * _MiB            # v7x: ~56 MiB usable per TensorCore
    else:
        budget = min(cap - 16 * _MiB, 112 * _MiB)   # v5e/v6e: use most of 128 MiB
    return max(budget, 16 * _MiB)


def _fused_vmem_bytes(tm, shapes, cdt, out_dtype, weight_bufs):
    d_in_p, d_h_p, d_out_p = shapes
    io = 2 * (_nbytes((tm, d_in_p), cdt) + _nbytes((tm, d_out_p), out_dtype))
    w = weight_bufs * (_nbytes((d_in_p, d_h_p), cdt) + _nbytes((d_h_p, d_out_p), cdt)
                       + _nbytes((1, d_h_p), jnp.float32)
                       + _nbytes((1, d_out_p), jnp.float32))
    interm = _nbytes((tm, d_h_p), jnp.float32) + _nbytes((tm, d_out_p), jnp.float32)
    return io + w + interm


def _tiled_vmem_bytes(tm, tk, shapes, cdt, out_dtype):
    d_in_p, d_h_p, d_out_p = shapes
    io = 2 * (_nbytes((tm, d_in_p), cdt) + _nbytes((tm, d_out_p), out_dtype))
    w = 2 * (_nbytes((d_in_p, tk), cdt) + _nbytes((tk, d_out_p), cdt)
             + _nbytes((1, tk), jnp.float32) + _nbytes((1, d_out_p), jnp.float32))
    acc = _nbytes((tm, d_out_p), jnp.float32)
    interm = _nbytes((tm, tk), jnp.float32) + _nbytes((tm, d_out_p), jnp.float32)
    return io + w + acc + interm


def _batch_tiles(B, tm_cap, sublane):
    """Split batch into near-equal sublane-aligned tiles <= tm_cap (bounded pad waste)."""
    B_s = _round_up(max(B, 1), sublane)
    n = max(1, -(-B_s // tm_cap))
    tm = _round_up(-(-B_s // n), sublane)
    return tm, n


# ---------------------------------------------------------------------------
# Parameter preparation (hoisted out of the per-call path -- do this ONCE)
# ---------------------------------------------------------------------------
def prepare_mlp_params(w1, b1, w2, b2, *, matmul_dtype=jnp.bfloat16, lane=128):
    """Pad & cast weights/biases once. Weights are [in, out] (transposed vs.
    torch.nn.Linear.weight); biases are 1-D. Use lane=256 for bf16 on v6e/v7x.

    Zero padding is exact: padded input columns / weight rows contribute 0,
    padded hidden units have bias 0 -> ReLU(0)=0 -> 0 contribution, and padded
    output columns are sliced off in mlp_forward."""
    cdt = jnp.dtype(matmul_dtype)
    d_in, d_h = w1.shape
    d_out = w2.shape[1]
    d_in_p = _round_up(d_in, lane)
    d_h_p = _round_up(d_h, lane)
    d_out_p = _round_up(d_out, lane)

    w1_p = jnp.zeros((d_in_p, d_h_p), cdt).at[:d_in, :d_h].set(w1.astype(cdt))
    b1_p = jnp.zeros((1, d_h_p), jnp.float32).at[0, :d_h].set(
        b1.reshape(-1).astype(jnp.float32))
    w2_p = jnp.zeros((d_h_p, d_out_p), cdt).at[:d_h, :d_out].set(w2.astype(cdt))
    b2_p = jnp.zeros((1, d_out_p), jnp.float32).at[0, :d_out].set(
        b2.reshape(-1).astype(jnp.float32))

    return {"w1": w1_p, "b1": b1_p, "w2": w2_p, "b2": b2_p,
            "dims": (d_in, d_h, d_out), "matmul_dtype": cdt}


# ---------------------------------------------------------------------------
# pallas_call wrappers
# ---------------------------------------------------------------------------
def _run_fused(x_p, w1_p, b1_p, w2_p, b2_p, tm, n_tiles, shapes, out_dtype, budget):
    d_in_p, d_h_p, d_out_p = shapes
    cdt = w1_p.dtype
    B_p = tm * n_tiles
    vmem = pltpu.MemorySpace.VMEM

    def build(weight_bufs):
        wmode = pl.Buffered(buffer_count=1) if weight_bufs == 1 else None
        est = _fused_vmem_bytes(tm, shapes, cdt, out_dtype, weight_bufs)
        vmem_limit = int(min(budget, max(est + 4 * _MiB, 32 * _MiB)))
        return pl.pallas_call(
            mlp_fused_kernel,
            out_shape=jax.ShapeDtypeStruct((B_p, d_out_p), out_dtype),
            grid_spec=pltpu.PrefetchScalarGridSpec(
                num_scalar_prefetch=0,
                grid=(n_tiles,),
                in_specs=[
                    # x streams per batch tile (double-buffered by default).
                    pl.BlockSpec((tm, d_in_p), lambda i: (i, 0), memory_space=vmem),
                    # Weights/biases: constant index_map -> DMA'd once, resident.
                    pl.BlockSpec((d_in_p, d_h_p), lambda i: (0, 0),
                                 memory_space=vmem, pipeline_mode=wmode),
                    pl.BlockSpec((1, d_h_p), lambda i: (0, 0),
                                 memory_space=vmem, pipeline_mode=wmode),
                    pl.BlockSpec((d_h_p, d_out_p), lambda i: (0, 0),
                                 memory_space=vmem, pipeline_mode=wmode),
                    pl.BlockSpec((1, d_out_p), lambda i: (0, 0),
                                 memory_space=vmem, pipeline_mode=wmode),
                ],
                out_specs=pl.BlockSpec((tm, d_out_p), lambda i: (i, 0),
                                       memory_space=vmem),
            ),
            compiler_params=pltpu.CompilerParams(
                dimension_semantics=("parallel",),
                vmem_limit_bytes=vmem_limit,
            ),
        )

    try:
        # Preferred: single-buffered resident weights (halves weight VMEM).
        return build(1)(x_p, w1_p, b1_p, w2_p, b2_p)
    except Exception:
        # Fallback for runtimes that reject Buffered(1): default double buffering.
        return build(2)(x_p, w1_p, b1_p, w2_p, b2_p)


def _run_tiled(x_p, w1_p, b1_p, w2_p, b2_p, tm, n_tiles, tk, shapes, out_dtype, budget):
    d_in_p, d_h_p, d_out_p = shapes
    cdt = w1_p.dtype
    B_p = tm * n_tiles
    nk = d_h_p // tk
    vmem = pltpu.MemorySpace.VMEM
    est = _tiled_vmem_bytes(tm, tk, shapes, cdt, out_dtype)
    vmem_limit = int(min(budget, max(est + 4 * _MiB, 32 * _MiB)))

    return pl.pallas_call(
        mlp_tiled_kernel,
        out_shape=jax.ShapeDtypeStruct((B_p, d_out_p), out_dtype),
        grid_spec=pltpu.PrefetchScalarGridSpec(
            num_scalar_prefetch=0,
            grid=(n_tiles, nk),
            in_specs=[
                pl.BlockSpec((tm, d_in_p), lambda i, k: (i, 0), memory_space=vmem),
                pl.BlockSpec((d_in_p, tk), lambda i, k: (0, k), memory_space=vmem),
                pl.BlockSpec((1, tk), lambda i, k: (0, k), memory_space=vmem),
                pl.BlockSpec((tk, d_out_p), lambda i, k: (k, 0), memory_space=vmem),
                pl.BlockSpec((1, d_out_p), lambda i, k: (0, 0), memory_space=vmem),
            ],
            out_specs=pl.BlockSpec((tm, d_out_p), lambda i, k: (i, 0),
                                   memory_space=vmem),
            scratch_shapes=[pltpu.VMEM((tm, d_out_p), jnp.float32)],
        ),
        compiler_params=pltpu.CompilerParams(
            dimension_semantics=("parallel", "arbitrary"),
            vmem_limit_bytes=vmem_limit,
        ),
    )(x_p, w1_p, b1_p, w2_p, b2_p)


def mlp_forward(x, params, *, force_tiled=False, hidden_tile=None):
    """Fused MLP forward: relu(x @ w1 + b1) @ w2 + b2. `params` comes from
    prepare_mlp_params (pad/cast hoisted out of the per-call path)."""
    B, d_in_x = x.shape
    d_in, d_h, d_out = params["dims"]
    assert d_in_x == d_in, "input feature dim mismatch"
    cdt = params["matmul_dtype"]
    w1_p, b1_p, w2_p, b2_p = params["w1"], params["b1"], params["w2"], params["b2"]
    d_in_p, d_h_p = w1_p.shape
    d_out_p = w2_p.shape[1]
    shapes = (d_in_p, d_h_p, d_out_p)
    out_dtype = x.dtype

    budget = _vmem_budget_bytes()
    sublane = max(8, 32 // cdt.itemsize)  # 8 f32, 16 bf16, 32 int8/fp8

    # Use the fused (resident-weight) kernel whenever the single-buffered
    # working set fits; otherwise fall back to the hidden-dim tiled kernel.
    min_fused = _fused_vmem_bytes(sublane, shapes, cdt, out_dtype, weight_bufs=1)
    use_fused = (not force_tiled) and (min_fused + 4 * _MiB <= budget)

    if use_fused:
        # Batch tile: as large as the VMEM budget allows, capped at 1024.
        tm_cap = min(1024, _round_up(B, sublane))
        tm, n_tiles = _batch_tiles(B, tm_cap, sublane)
        while tm > sublane and _fused_vmem_bytes(tm, shapes, cdt, out_dtype, 1) > budget:
            tm_cap = max(sublane, tm_cap // 2)
            tm, n_tiles = _batch_tiles(B, tm_cap, sublane)
        B_p = tm * n_tiles
        x_p = jnp.zeros((B_p, d_in_p), cdt).at[:B, :d_in].set(x.astype(cdt))
        out_p = _run_fused(x_p, w1_p, b1_p, w2_p, b2_p, tm, n_tiles, shapes,
                           out_dtype, budget)
    else:
        tm_cap = min(512, _round_up(B, sublane))
        tm, n_tiles = _batch_tiles(B, tm_cap, sublane)
        if hidden_tile is not None:
            tk = int(hidden_tile)
            assert tk % 128 == 0 and d_h_p % tk == 0, "hidden_tile must divide padded D_h"
        else:
            q = d_h_p // 128
            tk = 128
            for m in range(1, q + 1):            # ascending m -> descending tk
                if q % m:
                    continue
                tk = d_h_p // m
                if _tiled_vmem_bytes(tm, tk, shapes, cdt, out_dtype) <= budget:
                    break
        while tm > sublane and _tiled_vmem_bytes(tm, tk, shapes, cdt, out_dtype) > budget:
            tm_cap = max(sublane, tm_cap // 2)
            tm, n_tiles = _batch_tiles(B, tm_cap, sublane)
        B_p = tm * n_tiles
        x_p = jnp.zeros((B_p, d_in_p), cdt).at[:B, :d_in].set(x.astype(cdt))
        out_p = _run_tiled(x_p, w1_p, b1_p, w2_p, b2_p, tm, n_tiles, tk, shapes,
                           out_dtype, budget)

    return out_p[:B, :d_out]


# ---------------------------------------------------------------------------
# Self-test
# ---------------------------------------------------------------------------
if __name__ == "__main__":
    # Small shapes consistent with the module: MLP(input_dim=32, hidden_dim=64, output_dim=16)
    B, D_IN, D_H, D_OUT = 8, 32, 64, 16

    key = jax.random.PRNGKey(0)
    k_x, k_w1, k_b1, k_w2, k_b2 = jax.random.split(key, 5)

    x = jax.random.normal(k_x, (B, D_IN), dtype=jnp.float32)

    # Deterministic init mimicking nn.Linear's uniform(-1/sqrt(fan_in), 1/sqrt(fan_in)).
    bound1 = 1.0 / (D_IN ** 0.5)
    w1 = jax.random.uniform(k_w1, (D_IN, D_H), jnp.float32, -bound1, bound1)
    b1 = jax.random.uniform(k_b1, (D_H,), jnp.float32, -bound1, bound1)
    bound2 = 1.0 / (D_H ** 0.5)
    w2 = jax.random.uniform(k_w2, (D_H, D_OUT), jnp.float32, -bound2, bound2)
    b2 = jax.random.uniform(k_b2, (D_OUT,), jnp.float32, -bound2, bound2)

    hi = jax.lax.Precision.HIGHEST
    ref_f32 = jnp.maximum(jnp.dot(x, w1, precision=hi) + b1, 0.0)
    ref_f32 = jnp.dot(ref_f32, w2, precision=hi) + b2

    def ref_mixed(cdt):
        # Mirrors the kernel's compute exactly: cdt operands, f32 accumulation.
        h = jnp.dot(x.astype(cdt), w1.astype(cdt), preferred_element_type=jnp.float32)
        h = jnp.maximum(h + b1.astype(jnp.float32), 0.0)
        o = jnp.dot(h.astype(cdt), w2.astype(cdt), preferred_element_type=jnp.float32)
        return o + b2.astype(jnp.float32)

    # 1) Default path: bf16 MXU operands, f32 accumulation, fused resident-weight kernel.
    params_bf16 = prepare_mlp_params(w1, b1, w2, b2)  # matmul_dtype=bf16 by default
    out_bf16 = mlp_forward(x, params_bf16)
    jax.block_until_ready(out_bf16)
    assert out_bf16.shape == (B, D_OUT)
    assert jnp.allclose(out_bf16, ref_mixed(jnp.bfloat16), atol=2e-3, rtol=2e-3), \
        "bf16-operand kernel mismatch vs bf16-operand reference"
    assert jnp.allclose(out_bf16, ref_f32, atol=5e-2, rtol=5e-2), \
        "bf16-operand kernel too far from f32 reference"

    # 2) f32-operand path (near-exact vs f32 reference), fused kernel.
    params_f32 = prepare_mlp_params(w1, b1, w2, b2, matmul_dtype=jnp.float32)
    out_f32 = mlp_forward(x, params_f32)
    jax.block_until_ready(out_f32)
    assert out_f32.shape == (B, D_OUT)
    assert jnp.allclose(out_f32, ref_f32, atol=1e-4, rtol=1e-4), "f32 fused kernel mismatch"

    # 3) K/N-tiled fallback (forced), with a 2-step hidden-dim reduction to
    #    exercise the accumulator init/accumulate/finalize path.
    params_f32_256 = prepare_mlp_params(w1, b1, w2, b2, matmul_dtype=jnp.float32, lane=256)
    out_tiled = mlp_forward(x, params_f32_256, force_tiled=True, hidden_tile=128)
    jax.block_until_ready(out_tiled)
    assert out_tiled.shape == (B, D_OUT)
    assert jnp.allclose(out_tiled, ref_f32, atol=1e-4, rtol=1e-4), "tiled kernel mismatch"

    print("KERNEL_OK")
</pallas_src>

<mosaic_0001>
module attributes {stable_mosaic.version = 11 : i64} {
  func.func @mlp_fused_kernel(%arg0: i32, %arg1: memref<16x128xbf16, #tpu.memory_space<vmem>>, %arg2: memref<128x128xbf16, #tpu.memory_space<vmem>>, %arg3: memref<1x128xf32, #tpu.memory_space<vmem>>, %arg4: memref<128x128xbf16, #tpu.memory_space<vmem>>, %arg5: memref<1x128xf32, #tpu.memory_space<vmem>>, %arg6: memref<16x128xf32, #tpu.memory_space<vmem>>) attributes {dimension_semantics = [#tpu.dimension_semantics<parallel>], iteration_bounds = array<i64: 1>, scalar_prefetch = 0 : i64, scratch_operands = 0 : i64, tpu.core_type = #tpu.core_type<tc>, window_params = [{transform_indices = @transform_0, window_bounds = array<i64: 16, 128>}, {pipeline_mode = #tpu.pipeline_mode<synchronous>, transform_indices = @transform_1, window_bounds = array<i64: 128, 128>}, {pipeline_mode = #tpu.pipeline_mode<synchronous>, transform_indices = @transform_2, window_bounds = array<i64: 1, 128>}, {pipeline_mode = #tpu.pipeline_mode<synchronous>, transform_indices = @transform_3, window_bounds = array<i64: 128, 128>}, {pipeline_mode = #tpu.pipeline_mode<synchronous>, transform_indices = @transform_4, window_bounds = array<i64: 1, 128>}, {transform_indices = @transform_5, window_bounds = array<i64: 16, 128>}]} {
    %c0 = arith.constant 0 : index
    %c0_0 = arith.constant 0 : index
    %0 = vector.load %arg1[%c0, %c0_0] : memref<16x128xbf16, #tpu.memory_space<vmem>>, vector<16x128xbf16>
    %c0_1 = arith.constant 0 : index
    %c0_2 = arith.constant 0 : index
    %1 = vector.load %arg2[%c0_1, %c0_2] : memref<128x128xbf16, #tpu.memory_space<vmem>>, vector<128x128xbf16>
    %cst = arith.constant dense<0.000000e+00> : vector<16x128xf32>
    %2 = tpu.matmul %0, %1, %cst {dimension_numbers = #tpu.dot_dimension_numbers<[1], [0], [0], [1], [0, 0, 1, 1], [], []>} : vector<16x128xbf16>, vector<128x128xbf16>, vector<16x128xf32> -> vector<16x128xf32>
    %c0_3 = arith.constant 0 : index
    %c0_4 = arith.constant 0 : index
    %3 = vector.load %arg3[%c0_3, %c0_4] : memref<1x128xf32, #tpu.memory_space<vmem>>, vector<1x128xf32>
    %4 = vector.broadcast %3 : vector<1x128xf32> to vector<16x128xf32>
    %5 = arith.addf %2, %4 : vector<16x128xf32>
    %cst_5 = arith.constant 0.000000e+00 : f32
    %6 = vector.broadcast %cst_5 : f32 to vector<16x128xf32>
    %7 = arith.maximumf %5, %6 : vector<16x128xf32>
    %8 = arith.truncf %7 : vector<16x128xf32> to vector<16x128xbf16>
    %c0_6 = arith.constant 0 : index
    %c0_7 = arith.constant 0 : index
    %9 = vector.load %arg4[%c0_6, %c0_7] : memref<128x128xbf16, #tpu.memory_space<vmem>>, vector<128x128xbf16>
    %cst_8 = arith.constant dense<0.000000e+00> : vector<16x128xf32>
    %10 = tpu.matmul %8, %9, %cst_8 {dimension_numbers = #tpu.dot_dimension_numbers<[1], [0], [0], [1], [0, 0, 1, 1], [], []>} : vector<16x128xbf16>, vector<128x128xbf16>, vector<16x128xf32> -> vector<16x128xf32>
    %c0_9 = arith.constant 0 : index
    %c0_10 = arith.constant 0 : index
    %11 = vector.load %arg5[%c0_9, %c0_10] : memref<1x128xf32, #tpu.memory_space<vmem>>, vector<1x128xf32>
    %12 = vector.broadcast %11 : vector<1x128xf32> to vector<16x128xf32>
    %13 = arith.addf %10, %12 : vector<16x128xf32>
    %c0_11 = arith.constant 0 : index
    %c0_12 = arith.constant 0 : index
    %14 = vector.load %arg6[%c0_11, %c0_12] : memref<16x128xf32, #tpu.memory_space<vmem>>, vector<16x128xf32>
    tpu.vector_store %arg6[%c0_11, %c0_12], %13 {strides = array<i32>} : memref<16x128xf32, #tpu.memory_space<vmem>>, vector<16x128xf32>,
    return
  }
  func.func @transform_0(%arg0: i32) -> (i32, i32) {
    %c0_i32 = arith.constant 0 : i32
    %c0_i32_0 = arith.constant 0 : i32
    return %arg0, %c0_i32 : i32, i32
  }
  func.func @transform_1(%arg0: i32) -> (i32, i32) {
    %c0_i32 = arith.constant 0 : i32
    %c0_i32_0 = arith.constant 0 : i32
    %c0_i32_1 = arith.constant 0 : i32
    return %c0_i32, %c0_i32_0 : i32, i32
  }
  func.func @transform_2(%arg0: i32) -> (i32, i32) {
    %c0_i32 = arith.constant 0 : i32
    %c0_i32_0 = arith.constant 0 : i32
    %c0_i32_1 = arith.constant 0 : i32
    return %c0_i32, %c0_i32_0 : i32, i32
  }
  func.func @transform_3(%arg0: i32) -> (i32, i32) {
    %c0_i32 = arith.constant 0 : i32
    %c0_i32_0 = arith.constant 0 : i32
    %c0_i32_1 = arith.constant 0 : i32
    return %c0_i32, %c0_i32_0 : i32, i32
  }
  func.func @transform_4(%arg0: i32) -> (i32, i32) {
    %c0_i32 = arith.constant 0 : i32
    %c0_i32_0 = arith.constant 0 : i32
    %c0_i32_1 = arith.constant 0 : i32
    return %c0_i32, %c0_i32_0 : i32, i32
  }
  func.func @transform_5(%arg0: i32) -> (i32, i32) {
    %c0_i32 = arith.constant 0 : i32
    %c0_i32_0 = arith.constant 0 : i32
    return %arg0, %c0_i32 : i32, i32
  }
}

module attributes {stable_mosaic.version = 11 : i64} {
  func.func @mlp_fused_kernel(%arg0: i32, %arg1: memref<16x128xbf16, #tpu.memory_space<vmem>>, %arg2: memref<128x128xbf16, #tpu.memory_space<vmem>>, %arg3: memref<1x128xf32, #tpu.memory_space<vmem>>, %arg4: memref<128x128xbf16, #tpu.memory_space<vmem>>, %arg5: memref<1x128xf32, #tpu.memory_space<vmem>>, %arg6: memref<16x128xf32, #tpu.memory_space<vmem>>) attributes {dimension_semantics = [#tpu.dimension_semantics<parallel>], iteration_bounds = array<i64: 1>, scalar_prefetch = 0 : i64, scratch_operands = 0 : i64, tpu.core_type = #tpu.core_type<tc>, window_params = [{transform_indices = @transform_0, window_bounds = array<i64: 16, 128>}, {pipeline_mode = #tpu.pipeline_mode<synchronous>, transform_indices = @transform_1, window_bounds = array<i64: 128, 128>}, {pipeline_mode = #tpu.pipeline_mode<synchronous>, transform_indices = @transform_2, window_bounds = array<i64: 1, 128>}, {pipeline_mode = #tpu.pipeline_mode<synchronous>, transform_indices = @transform_3, window_bounds = array<i64: 128, 128>}, {pipeline_mode = #tpu.pipeline_mode<synchronous>, transform_indices = @transform_4, window_bounds = array<i64: 1, 128>}, {transform_indices = @transform_5, window_bounds = array<i64: 16, 128>}]} {
    %c0 = arith.constant 0 : index
    %c0_0 = arith.constant 0 : index
    %0 = vector.load %arg1[%c0, %c0_0] : memref<16x128xbf16, #tpu.memory_space<vmem>>, vector<16x128xbf16>
    %c0_1 = arith.constant 0 : index
    %c0_2 = arith.constant 0 : index
    %1 = vector.load %arg2[%c0_1, %c0_2] : memref<128x128xbf16, #tpu.memory_space<vmem>>, vector<128x128xbf16>
    %cst = arith.constant dense<0.000000e+00> : vector<16x128xf32>
    %2 = tpu.matmul %0, %1, %cst {dimension_numbers = #tpu.dot_dimension_numbers<[1], [0], [0], [1], [0, 0, 1, 1], [], []>} : vector<16x128xbf16>, vector<128x128xbf16>, vector<16x128xf32> -> vector<16x128xf32>
    %c0_3 = arith.constant 0 : index
    %c0_4 = arith.constant 0 : index
    %3 = vector.load %arg3[%c0_3, %c0_4] : memref<1x128xf32, #tpu.memory_space<vmem>>, vector<1x128xf32>
    %4 = vector.broadcast %3 : vector<1x128xf32> to vector<16x128xf32>
    %5 = arith.addf %2, %4 : vector<16x128xf32>
    %cst_5 = arith.constant 0.000000e+00 : f32
    %6 = vector.broadcast %cst_5 : f32 to vector<16x128xf32>
    %7 = arith.maximumf %5, %6 : vector<16x128xf32>
    %8 = arith.truncf %7 : vector<16x128xf32> to vector<16x128xbf16>
    %c0_6 = arith.constant 0 : index
    %c0_7 = arith.constant 0 : index
    %9 = vector.load %arg4[%c0_6, %c0_7] : memref<128x128xbf16, #tpu.memory_space<vmem>>, vector<128x128xbf16>
    %cst_8 = arith.constant dense<0.000000e+00> : vector<16x128xf32>
    %10 = tpu.matmul %8, %9, %cst_8 {dimension_numbers = #tpu.dot_dimension_numbers<[1], [0], [0], [1], [0, 0, 1, 1], [], []>} : vector<16x128xbf16>, vector<128x128xbf16>, vector<16x128xf32> -> vector<16x128xf32>
    %c0_9 = arith.constant 0 : index
    %c0_10 = arith.constant 0 : index
    %11 = vector.load %arg5[%c0_9, %c0_10] : memref<1x128xf32, #tpu.memory_space<vmem>>, vector<1x128xf32>
    %12 = vector.broadcast %11 : vector<1x128xf32> to vector<16x128xf32>
    %13 = arith.addf %10, %12 : vector<16x128xf32>
    %c0_11 = arith.constant 0 : index
    %c0_12 = arith.constant 0 : index
    %14 = vector.load %arg6[%c0_11, %c0_12] : memref<16x128xf32, #tpu.memory_space<vmem>>, vector<16x128xf32>
    tpu.vector_store %arg6[%c0_11, %c0_12], %13 {strides = array<i32>} : memref<16x128xf32, #tpu.memory_space<vmem>>, vector<16x128xf32>,
    return
  }
  func.func @transform_0(%arg0: i32) -> (i32, i32) {
    %c0_i32 = arith.constant 0 : i32
    %c0_i32_0 = arith.constant 0 : i32
    return %arg0, %c0_i32 : i32, i32
  }
  func.func @transform_1(%arg0: i32) -> (i32, i32) {
    %c0_i32 = arith.constant 0 : i32
    %c0_i32_0 = arith.constant 0 : i32
    %c0_i32_1 = arith.constant 0 : i32
    return %c0_i32, %c0_i32_0 : i32, i32
  }
  func.func @transform_2(%arg0: i32) -> (i32, i32) {
    %c0_i32 = arith.constant 0 : i32
    %c0_i32_0 = arith.constant 0 : i32
    %c0_i32_1 = arith.constant 0 : i32
    return %c0_i32, %c0_i32_0 : i32, i32
  }
  func.func @transform_3(%arg0: i32) -> (i32, i32) {
    %c0_i32 = arith.constant 0 : i32
    %c0_i32_0 = arith.constant 0 : i32
    %c0_i32_1 = arith.constant 0 : i32
    return %c0_i32, %c0_i32_0 : i32, i32
  }
  func.func @transform_4(%arg0: i32) -> (i32, i32) {
    %c0_i32 = arith.constant 0 : i32
    %c0_i32_0 = arith.constant 0 : i32
    %c0_i32_1 = arith.constant 0 : i32
    return %c0_i32, %c0_i32_0 : i32, i32
  }
  func.func @transform_5(%arg0: i32) -> (i32, i32) {
    %c0_i32 = arith.constant 0 : i32
    %c0_i32_0 = arith.constant 0 : i32
    return %arg0, %c0_i32 : i32, i32
  }
}

</mosaic_0001>

<bundles_post_ra>
// kernel: tpu_custom_call.1
= control target key start
LH: loop header
LB: loop body
LE: loop exit
PB: predicated region body
PF: predicated region fallthrough
CT: control target
= control target key end

     0   :  { %10 = vsyncpa [#allocation3], 0  ;;  %s626_s0 = inlined_call_operand.hbm [shape: bf16[16,128], index: 0, kind: input, shape index: {}]   ;;  %s627_s1 = inlined_call_operand.hbm [shape: bf16[128,128], index: 1, kind: input, shape index: {}]   ;;  %s628_s2 = inlined_call_operand.vmem [shape: f32[1,128], index: 2, kind: input, shape index: {}]   ;;  %s629_s3 = inlined_call_operand.hbm [shape: bf16[128,128], index: 3, kind: input, shape index: {}]   ;;  %s630_s4 = inlined_call_operand.vmem [shape: f32[1,128], index: 4, kind: input, shape index: {}]   ;;  %s631_s5 = inlined_call_operand.hbm [shape: f32[16,128], index: 5, kind: output, shape index: {}]  }
   0x1   :  { %11 = vsyncpa [#allocation6], 0 }
   0x2   :  { %12 = vsyncpa [#allocation4], 0  ;;  %s516_s18 = smov [#allocation5]   ;;  %s517_s20 = smov [#allocation2]  }
   0x3   :  { %s30_s19 = sshll.u32 %s516_s18, 4  ;;  %s18_s21 = sshll.u32 %s517_s20, 4  ;;  %s31_s19 = int_to_ptr.vmem [resolvable:$true] %s30_s19  ;;  %s556_s21 = int_to_ptr.vmem [resolvable:$true] %s18_s21 }
   0x4   :  { %s422_s24 = scalar_lea.hbm %s627_s1, 1024 }
   0x5   :  { %p423_p0 = scmp.ne.s32.totalorder %s627_s1, %s422_s24  ;;  %p426_p1 = scmp.lt.u32.totalorder %s422_s24, %s627_s1 }
   0x7   :  { %p428_p2 = pnand %p426_p1, %p423_p0 }
   0x9   :  { %431 = shalt.err (!%p428_p2)
}
   0xa   :  { %s432_s29 = scalar_lea.vmem %s31_s19, 1024  ;;  %p437_p4 = scmp.lt.s32.totalorder %s31_s19, %s31_s19 }
   0xb   :  { %p433_p3 = scmp.ne.s32.totalorder %s31_s19, %s432_s29  ;;  %p438_p5 = scmp.lt.s32.totalorder %s432_s29, %s432_s29 }
   0xd   :  { %p439_p6 = por %p438_p5, %p437_p4 }
   0xf   :  { %p440_p7 = pnand %p439_p6, %p433_p3 }
  0x11   :  { %443 = shalt.err (!%p440_p7)
}
  0x12   :  { %s518_s30 = smov 64   ;;  %s519_s6 = smov 4  }
  0x13   :  { %36 = dma.hbm_to_vmem [thread:$0]  %s627_s1, 1024, %s31_s19, [#allocation6], %s518_s30, %s518_s30, %s519_s6  }
  0x14   :  { %s444_s11 = scalar_lea.hbm %s626_s0, 128 }
  0x15   :  { %p445_p8 = scmp.ne.s32.totalorder %s626_s0, %s444_s11  ;;  %p448_p9 = scmp.lt.u32.totalorder %s444_s11, %s626_s0 }
  0x17   :  { %p450_p10 = pnand %p448_p9, %p445_p8 }
  0x19   :  { %453 = shalt.err (!%p450_p10)
}
  0x1a   :  { %s454_s16 = scalar_lea.vmem %s556_s21, 128  ;;  %p459_p12 = scmp.lt.s32.totalorder %s556_s21, %s556_s21 }
  0x1b   :  { %p455_p11 = scmp.ne.s32.totalorder %s556_s21, %s454_s16  ;;  %p460_p13 = scmp.lt.s32.totalorder %s454_s16, %s454_s16 }
  0x1d   :  { %p461_p0 = por %p460_p13, %p459_p12 }
  0x1f   :  { %p462_p1 = pnand %p461_p0, %p455_p11 }
  0x21   :  { %465 = shalt.err (!%p462_p1)
}
  0x22   :  { %24 = dma.hbm_to_vmem [thread:$0]  %s626_s0, 128, %s556_s21, [#allocation3], %s518_s30, %s518_s30, %s519_s6  }
  0x23   :  { %s520_s18 = smov [#allocation7]   ;;  %s466_s23 = scalar_lea.hbm %s629_s3, 1024 }
  0x24   :  { %s44_s19 = sshll.u32 %s520_s18, 4  ;;  %p467_p2 = scmp.ne.s32.totalorder %s629_s3, %s466_s23  ;;  %s45_s19 = int_to_ptr.vmem [resolvable:$true] %s44_s19 }
  0x25   :  { %p470_p3 = scmp.lt.u32.totalorder %s466_s23, %s629_s3 }
  0x27   :  { %p472_p4 = pnand %p470_p3, %p467_p2 }
  0x29   :  { %475 = shalt.err (!%p472_p4)
}
  0x2a   :  { %s476_s28 = scalar_lea.vmem %s45_s19, 1024  ;;  %p481_p6 = scmp.lt.s32.totalorder %s45_s19, %s45_s19 }
  0x2b   :  { %p477_p5 = scmp.ne.s32.totalorder %s45_s19, %s476_s28  ;;  %p482_p7 = scmp.lt.s32.totalorder %s476_s28, %s476_s28 }
  0x2d   :  { %p483_p8 = por %p482_p7, %p481_p6 }
  0x2f   :  { %p484_p9 = pnand %p483_p8, %p477_p5 }
  0x31   :  { %487 = shalt.err (!%p484_p9)
}
  0x32   :  { %50 = dma.hbm_to_vmem [thread:$0]  %s629_s3, 1024, %s45_s19, [#allocation6], %s518_s30, %s518_s30, %s519_s6  }
  0x33   :  { %510 = dma.done.wait [#allocation3], 128  }
  0x34   :  { %511 = vsyncadd [#allocation3], 4294967168 }
  0x35   :  { %512 = dma.done.wait [#allocation6], 2048  }
  0x36   :  { %513 = vsyncadd [#allocation6], 4294965248  ;;  %v521_v0 = vmov 0.0   ;;  %vm522_vm0 = vmmov 0   ;;  %v405_v1 = vld [vmem:[#allocation5] sm:$0xff]   ;;  %v406_v2 = vld [vmem:[#allocation5 + $0x8] sm:$0xff]  }
  0x37   :  { %355 = vmatprep.subr.bf16.mxu0 %v521_v0  ;;  %371 = vmatprep.mubr.msk.bf16.mxu0 %vm522_vm0, %v521_v0  ;;  %v407_v3 = vld [vmem:[#allocation5 + $0x10] sm:$0xff]   ;;  %v414_v4 = vld [vmem:[#allocation7] sm:$0xff]   ;;  %v408_v5 = vld [vmem:[#allocation5 + $0x18] sm:$0xff]   ;;  %s523_s7 = smov [#allocation8]  }
  0x38   :  { %375 = vmatprep.subr.bf16.mxu1 %v521_v0  ;;  %391 = vmatprep.mubr.msk.bf16.mxu1 %vm522_vm0, %v521_v0  ;;  %v415_v6 = vld [vmem:[#allocation7 + $0x8] sm:$0xff]   ;;  %v409_v7 = vld [vmem:[#allocation5 + $0x20] sm:$0xff]   ;;  %v416_v8 = vld [vmem:[#allocation7 + $0x10] sm:$0xff]   ;;  %s305_s8 = sshll.u32 %s523_s7, 4  ;;  %s306_s8 = int_to_ptr.vmem [resolvable:$true] %s305_s8 }
  0x39   :  { %356 = vmatpush3.bf16.msra.mxu0 %v405_v1  ;;  %376 = vmatpush3.bf16.msra.mxu1 %v414_v4  ;;  %v410_v9 = vld [vmem:[#allocation5 + $0x28] sm:$0xff]   ;;  %v417_v10 = vld [vmem:[#allocation7 + $0x18] sm:$0xff]   ;;  %v411_v11 = vld [vmem:[#allocation5 + $0x30] sm:$0xff]   ;;  %p493_p11 = scmp.lt.s32.totalorder %s306_s8, %s306_s8 }
  0x3a   :  { %357 = vmatprep.subr.bf16.mxu0 %v521_v0  ;;  %377 = vmatprep.subr.bf16.mxu1 %v521_v0  ;;  %v418_v12 = vld [vmem:[#allocation7 + $0x20] sm:$0xff]   ;;  %v412_v13 = vld [vmem:[#allocation5 + $0x38] sm:$0xff]   ;;  %v419_v14 = vld [vmem:[#allocation7 + $0x28] sm:$0xff]  }
  0x3b   :  { %v413_v15 = vld [vmem:[#allocation2] sm:$0xff]   ;;  %v420_v16 = vld [vmem:[#allocation7 + $0x30] sm:$0xff]  }
  0x3c   :  { %v421_v17 = vld [vmem:[#allocation7 + $0x38] sm:$0xff]  }
  0x3d   :  { %358 = vmatpush3.bf16.msra.mxu0 %v406_v2  ;;  %378 = vmatpush3.bf16.msra.mxu1 %v415_v6  ;;  %v318_v18 = vld [vmem:[%s628_s2] ss:$0 sm:$0xff]  ;;  %s488_s2 = scalar_lea.vmem %s306_s8, 256 }
  0x3e   :  { %359 = vmatprep.subr.bf16.mxu0 %v521_v0  ;;  %379 = vmatprep.subr.bf16.mxu1 %v521_v0  ;;  %v328_v28 = vld [vmem:[%s630_s4] ss:$0 sm:$0xff]  ;;  %p489_p10 = scmp.ne.s32.totalorder %s306_s8, %s488_s2  ;;  %p494_p12 = scmp.lt.s32.totalorder %s488_s2, %s488_s2 }
  0x40   :  { %p495_p13 = por %p494_p12, %p493_p11 }
  0x41   :  { %360 = vmatpush3.bf16.msra.mxu0 %v407_v3  ;;  %380 = vmatpush3.bf16.msra.mxu1 %v416_v8 }
  0x42   :  { %361 = vmatprep.subr.bf16.mxu0 %v521_v0  ;;  %381 = vmatprep.subr.bf16.mxu1 %v521_v0  ;;  %p496_p0 = pnand %p495_p13, %p489_p10 }
  0x45   :  { %362 = vmatpush3.bf16.msra.mxu0 %v408_v5  ;;  %382 = vmatpush3.bf16.msra.mxu1 %v417_v10 }
  0x46   :  { %363 = vmatprep.subr.bf16.mxu0 %v521_v0  ;;  %383 = vmatprep.subr.bf16.mxu1 %v521_v0 }
  0x49   :  { %364 = vmatpush3.bf16.msra.mxu0 %v409_v7  ;;  %384 = vmatpush3.bf16.msra.mxu1 %v418_v12 }
  0x4a   :  { %365 = vmatprep.subr.bf16.mxu0 %v521_v0  ;;  %385 = vmatprep.subr.bf16.mxu1 %v521_v0 }
  0x4d   :  { %366 = vmatpush3.bf16.msra.mxu0 %v410_v9  ;;  %386 = vmatpush3.bf16.msra.mxu1 %v419_v14 }
  0x4e   :  { %367 = vmatprep.subr.bf16.mxu0 %v521_v0  ;;  %387 = vmatprep.subr.bf16.mxu1 %v521_v0 }
  0x51   :  { %368 = vmatpush3.bf16.msra.mxu0 %v411_v11  ;;  %388 = vmatpush3.bf16.msra.mxu1 %v420_v16 }
  0x52   :  { %369 = vmatprep.subr.bf16.mxu0 %v521_v0  ;;  %389 = vmatprep.subr.bf16.mxu1 %v521_v0 }
  0x55   :  { %370 = vmatpush3.bf16.msra.mxu0 %v412_v13  ;;  %390 = vmatpush3.bf16.msra.mxu1 %v421_v17 }
  0x58   :  { %372 = vmatmul.mubr.bf16.vlgmr.msra.gmra.mrb[0].mxu0 %v413_v15 }
 0x12b   :  { %v176_v19 = vpop.f32.mrb[0].mxu0 }
 0x12c   :  { %v177_v20 = vadd.f32 %v318_v18, %v176_v19  ;;  %v373_v21 = vpop.f32.mrb[1].mxu0 }
 0x12d   :  { %v179_v22 = vpop.f32.mrb[2].mxu0 }
 0x12e   :  { %v180_v23 = vadd.f32 %v318_v18, %v179_v22  ;;  %v374_v24 = vpop.f32.mrb[3].mxu0  ;;  %v183_v25 = vmax.f32 %v177_v20, 0.0 }
 0x130   :  { %v184_v26 = vmax.f32 %v180_v23, 0.0 }
 0x132   :  { %v185_v27 = vpack.c.bf16 %v184_v26, %v183_v25 }
 0x134   :  { %392 = vmatmul.mubr.bf16.vlgmr.msra.gmra.mrb[0].mxu1 %v185_v27 }
 0x207   :  { %v291_v29 = vpop.f32.mrb[0].mxu1 }
 0x208   :  { %v292_v30 = vadd.f32 %v328_v28, %v291_v29  ;;  %v393_v31 = vpop.f32.mrb[1].mxu1 }
 0x209   :  { %v294_v32 = vpop.f32.mrb[2].mxu1 }
 0x20a   :  { %298 = vst [vmem:[#allocation8] sm:$0xff] %v292_v30  ;;  %v295_v33 = vadd.f32 %v328_v28, %v294_v32  ;;  %v394_v34 = vpop.f32.mrb[3].mxu1 }
 0x20c   :  { %299 = vst [vmem:[#allocation8 + $0x8] sm:$0xff] %v295_v33 }
 0x20d   :  { %499 = shalt.err (!%p496_p0)
}
 0x20e   :  { %s500_s10 = scalar_lea.hbm %s631_s5, 256 }
 0x20f   :  { %p501_p1 = scmp.ne.s32.totalorder %s631_s5, %s500_s10  ;;  %p504_p2 = scmp.lt.u32.totalorder %s500_s10, %s631_s5 }
 0x211   :  { %p506_p3 = pnand %p504_p2, %p501_p1 }
 0x213   :  { %509 = shalt.err (!%p506_p3)
}
 0x214   :  { %s524_s15 = smov 128   ;;  %s525_s16 = smov 8  }
 0x215   :  { %311 = dma.vmem_to_hbm [thread:$0]  %s306_s8, 256, %s631_s5, [#allocation4], %s524_s15, %s524_s15, %s525_s16  }
 0x216   :  { %514 = dma.done.wait [#allocation4], 256  }
 0x217   :  { %515 = vsyncadd [#allocation4], 4294967040 }
 0x218   :  { %315 = vsyncpa [#allocation3], 1 }
 0x219   :  { %316 = vsyncpa [#allocation6], 1 }
 0x21a   :  { %317 = vsyncpa [#allocation4], 1 }

// kernel: tpu_custom_call.1
= control target key start
LH: loop header
LB: loop body
LE: loop exit
PB: predicated region body
PF: predicated region fallthrough
CT: control target
= control target key end

     0   :  { %10 = vsyncpa [#allocation3], 0  ;;  %s626_s0 = inlined_call_operand.hbm [shape: bf16[16,128], index: 0, kind: input, shape index: {}]   ;;  %s627_s1 = inlined_call_operand.hbm [shape: bf16[128,128], index: 1, kind: input, shape index: {}]   ;;  %s628_s2 = inlined_call_operand.vmem [shape: f32[1,128], index: 2, kind: input, shape index: {}]   ;;  %s629_s3 = inlined_call_operand.hbm [shape: bf16[128,128], index: 3, kind: input, shape index: {}]   ;;  %s630_s4 = inlined_call_operand.vmem [shape: f32[1,128], index: 4, kind: input, shape index: {}]   ;;  %s631_s5 = inlined_call_operand.hbm [shape: f32[16,128], index: 5, kind: output, shape index: {}]  }
   0x1   :  { %11 = vsyncpa [#allocation6], 0 }
   0x2   :  { %12 = vsyncpa [#allocation4], 0  ;;  %s516_s18 = smov [#allocation5]   ;;  %s517_s20 = smov [#allocation2]  }
   0x3   :  { %s30_s19 = sshll.u32 %s516_s18, 4  ;;  %s18_s21 = sshll.u32 %s517_s20, 4  ;;  %s31_s19 = int_to_ptr.vmem [resolvable:$true] %s30_s19  ;;  %s556_s21 = int_to_ptr.vmem [resolvable:$true] %s18_s21 }
   0x4   :  { %s422_s24 = scalar_lea.hbm %s627_s1, 1024 }
   0x5   :  { %p423_p0 = scmp.ne.s32.totalorder %s627_s1, %s422_s24  ;;  %p426_p1 = scmp.lt.u32.totalorder %s422_s24, %s627_s1 }
   0x7   :  { %p428_p2 = pnand %p426_p1, %p423_p0 }
   0x9   :  { %431 = shalt.err (!%p428_p2)
}
   0xa   :  { %s432_s29 = scalar_lea.vmem %s31_s19, 1024  ;;  %p437_p4 = scmp.lt.s32.totalorder %s31_s19, %s31_s19 }
   0xb   :  { %p433_p3 = scmp.ne.s32.totalorder %s31_s19, %s432_s29  ;;  %p438_p5 = scmp.lt.s32.totalorder %s432_s29, %s432_s29 }
   0xd   :  { %p439_p6 = por %p438_p5, %p437_p4 }
   0xf   :  { %p440_p7 = pnand %p439_p6, %p433_p3 }
  0x11   :  { %443 = shalt.err (!%p440_p7)
}
  0x12   :  { %s518_s30 = smov 64   ;;  %s519_s6 = smov 4  }
  0x13   :  { %36 = dma.hbm_to_vmem [thread:$0]  %s627_s1, 1024, %s31_s19, [#allocation6], %s518_s30, %s518_s30, %s519_s6  }
  0x14   :  { %s444_s11 = scalar_lea.hbm %s626_s0, 128 }
  0x15   :  { %p445_p8 = scmp.ne.s32.totalorder %s626_s0, %s444_s11  ;;  %p448_p9 = scmp.lt.u32.totalorder %s444_s11, %s626_s0 }
  0x17   :  { %p450_p10 = pnand %p448_p9, %p445_p8 }
  0x19   :  { %453 = shalt.err (!%p450_p10)
}
  0x1a   :  { %s454_s16 = scalar_lea.vmem %s556_s21, 128  ;;  %p459_p12 = scmp.lt.s32.totalorder %s556_s21, %s556_s21 }
  0x1b   :  { %p455_p11 = scmp.ne.s32.totalorder %s556_s21, %s454_s16  ;;  %p460_p13 = scmp.lt.s32.totalorder %s454_s16, %s454_s16 }
  0x1d   :  { %p461_p0 = por %p460_p13, %p459_p12 }
  0x1f   :  { %p462_p1 = pnand %p461_p0, %p455_p11 }
  0x21   :  { %465 = shalt.err (!%p462_p1)
}
  0x22   :  { %24 = dma.hbm_to_vmem [thread:$0]  %s626_s0, 128, %s556_s21, [#allocation3], %s518_s30, %s518_s30, %s519_s6  }
  0x23   :  { %s520_s18 = smov [#allocation7]   ;;  %s466_s23 = scalar_lea.hbm %s629_s3, 1024 }
  0x24   :  { %s44_s19 = sshll.u32 %s520_s18, 4  ;;  %p467_p2 = scmp.ne.s32.totalorder %s629_s3, %s466_s23  ;;  %s45_s19 = int_to_ptr.vmem [resolvable:$true] %s44_s19 }
  0x25   :  { %p470_p3 = scmp.lt.u32.totalorder %s466_s23, %s629_s3 }
  0x27   :  { %p472_p4 = pnand %p470_p3, %p467_p2 }
  0x29   :  { %475 = shalt.err (!%p472_p4)
}
  0x2a   :  { %s476_s28 = scalar_lea.vmem %s45_s19, 1024  ;;  %p481_p6 = scmp.lt.s32.totalorder %s45_s19, %s45_s19 }
  0x2b   :  { %p477_p5 = scmp.ne.s32.totalorder %s45_s19, %s476_s28  ;;  %p482_p7 = scmp.lt.s32.totalorder %s476_s28, %s476_s28 }
  0x2d   :  { %p483_p8 = por %p482_p7, %p481_p6 }
  0x2f   :  { %p484_p9 = pnand %p483_p8, %p477_p5 }
  0x31   :  { %487 = shalt.err (!%p484_p9)
}
  0x32   :  { %50 = dma.hbm_to_vmem [thread:$0]  %s629_s3, 1024, %s45_s19, [#allocation6], %s518_s30, %s518_s30, %s519_s6  }
  0x33   :  { %510 = dma.done.wait [#allocation3], 128  }
  0x34   :  { %511 = vsyncadd [#allocation3], 4294967168 }
  0x35   :  { %512 = dma.done.wait [#allocation6], 2048  }
  0x36   :  { %513 = vsyncadd [#allocation6], 4294965248  ;;  %v521_v0 = vmov 0.0   ;;  %vm522_vm0 = vmmov 0   ;;  %v405_v1 = vld [vmem:[#allocation5] sm:$0xff]   ;;  %v406_v2 = vld [vmem:[#allocation5 + $0x8] sm:$0xff]  }
  0x37   :  { %355 = vmatprep.subr.bf16.mxu0 %v521_v0  ;;  %371 = vmatprep.mubr.msk.bf16.mxu0 %vm522_vm0, %v521_v0  ;;  %v407_v3 = vld [vmem:[#allocation5 + $0x10] sm:$0xff]   ;;  %v414_v4 = vld [vmem:[#allocation7] sm:$0xff]   ;;  %v408_v5 = vld [vmem:[#allocation5 + $0x18] sm:$0xff]   ;;  %s523_s7 = smov [#allocation8]  }
  0x38   :  { %375 = vmatprep.subr.bf16.mxu1 %v521_v0  ;;  %391 = vmatprep.mubr.msk.bf16.mxu1 %vm522_vm0, %v521_v0  ;;  %v415_v6 = vld [vmem:[#allocation7 + $0x8] sm:$0xff]   ;;  %v409_v7 = vld [vmem:[#allocation5 + $0x20] sm:$0xff]   ;;  %v416_v8 = vld [vmem:[#allocation7 + $0x10] sm:$0xff]   ;;  %s305_s8 = sshll.u32 %s523_s7, 4  ;;  %s306_s8 = int_to_ptr.vmem [resolvable:$true] %s305_s8 }
  0x39   :  { %356 = vmatpush3.bf16.msra.mxu0 %v405_v1  ;;  %376 = vmatpush3.bf16.msra.mxu1 %v414_v4  ;;  %v410_v9 = vld [vmem:[#allocation5 + $0x28] sm:$0xff]   ;;  %v417_v10 = vld [vmem:[#allocation7 + $0x18] sm:$0xff]   ;;  %v411_v11 = vld [vmem:[#allocation5 + $0x30] sm:$0xff]   ;;  %p493_p11 = scmp.lt.s32.totalorder %s306_s8, %s306_s8 }
  0x3a   :  { %357 = vmatprep.subr.bf16.mxu0 %v521_v0  ;;  %377 = vmatprep.subr.bf16.mxu1 %v521_v0  ;;  %v418_v12 = vld [vmem:[#allocation7 + $0x20] sm:$0xff]   ;;  %v412_v13 = vld [vmem:[#allocation5 + $0x38] sm:$0xff]   ;;  %v419_v14 = vld [vmem:[#allocation7 + $0x28] sm:$0xff]  }
  0x3b   :  { %v413_v15 = vld [vmem:[#allocation2] sm:$0xff]   ;;  %v420_v16 = vld [vmem:[#allocation7 + $0x30] sm:$0xff]  }
  0x3c   :  { %v421_v17 = vld [vmem:[#allocation7 + $0x38] sm:$0xff]  }
  0x3d   :  { %358 = vmatpush3.bf16.msra.mxu0 %v406_v2  ;;  %378 = vmatpush3.bf16.msra.mxu1 %v415_v6  ;;  %v318_v18 = vld [vmem:[%s628_s2] ss:$0 sm:$0xff]  ;;  %s488_s2 = scalar_lea.vmem %s306_s8, 256 }
  0x3e   :  { %359 = vmatprep.subr.bf16.mxu0 %v521_v0  ;;  %379 = vmatprep.subr.bf16.mxu1 %v521_v0  ;;  %v328_v28 = vld [vmem:[%s630_s4] ss:$0 sm:$0xff]  ;;  %p489_p10 = scmp.ne.s32.totalorder %s306_s8, %s488_s2  ;;  %p494_p12 = scmp.lt.s32.totalorder %s488_s2, %s488_s2 }
  0x40   :  { %p495_p13 = por %p494_p12, %p493_p11 }
  0x41   :  { %360 = vmatpush3.bf16.msra.mxu0 %v407_v3  ;;  %380 = vmatpush3.bf16.msra.mxu1 %v416_v8 }
  0x42   :  { %361 = vmatprep.subr.bf16.mxu0 %v521_v0  ;;  %381 = vmatprep.subr.bf16.mxu1 %v521_v0  ;;  %p496_p0 = pnand %p495_p13, %p489_p10 }
  0x45   :  { %362 = vmatpush3.bf16.msra.mxu0 %v408_v5  ;;  %382 = vmatpush3.bf16.msra.mxu1 %v417_v10 }
  0x46   :  { %363 = vmatprep.subr.bf16.mxu0 %v521_v0  ;;  %383 = vmatprep.subr.bf16.mxu1 %v521_v0 }
  0x49   :  { %364 = vmatpush3.bf16.msra.mxu0 %v409_v7  ;;  %384 = vmatpush3.bf16.msra.mxu1 %v418_v12 }
  0x4a   :  { %365 = vmatprep.subr.bf16.mxu0 %v521_v0  ;;  %385 = vmatprep.subr.bf16.mxu1 %v521_v0 }
  0x4d   :  { %366 = vmatpush3.bf16.msra.mxu0 %v410_v9  ;;  %386 = vmatpush3.bf16.msra.mxu1 %v419_v14 }
  0x4e   :  { %367 = vmatprep.subr.bf16.mxu0 %v521_v0  ;;  %387 = vmatprep.subr.bf16.mxu1 %v521_v0 }
  0x51   :  { %368 = vmatpush3.bf16.msra.mxu0 %v411_v11  ;;  %388 = vmatpush3.bf16.msra.mxu1 %v420_v16 }
  0x52   :  { %369 = vmatprep.subr.bf16.mxu0 %v521_v0  ;;  %389 = vmatprep.subr.bf16.mxu1 %v521_v0 }
  0x55   :  { %370 = vmatpush3.bf16.msra.mxu0 %v412_v13  ;;  %390 = vmatpush3.bf16.msra.mxu1 %v421_v17 }
  0x58   :  { %372 = vmatmul.mubr.bf16.vlgmr.msra.gmra.mrb[0].mxu0 %v413_v15 }
 0x12b   :  { %v176_v19 = vpop.f32.mrb[0].mxu0 }
 0x12c   :  { %v177_v20 = vadd.f32 %v318_v18, %v176_v19  ;;  %v373_v21 = vpop.f32.mrb[1].mxu0 }
 0x12d   :  { %v179_v22 = vpop.f32.mrb[2].mxu0 }
 0x12e   :  { %v180_v23 = vadd.f32 %v318_v18, %v179_v22  ;;  %v374_v24 = vpop.f32.mrb[3].mxu0  ;;  %v183_v25 = vmax.f32 %v177_v20, 0.0 }
 0x130   :  { %v184_v26 = vmax.f32 %v180_v23, 0.0 }
 0x132   :  { %v185_v27 = vpack.c.bf16 %v184_v26, %v183_v25 }
 0x134   :  { %392 = vmatmul.mubr.bf16.vlgmr.msra.gmra.mrb[0].mxu1 %v185_v27 }
 0x207   :  { %v291_v29 = vpop.f32.mrb[0].mxu1 }
 0x208   :  { %v292_v30 = vadd.f32 %v328_v28, %v291_v29  ;;  %v393_v31 = vpop.f32.mrb[1].mxu1 }
 0x209   :  { %v294_v32 = vpop.f32.mrb[2].mxu1 }
 0x20a   :  { %298 = vst [vmem:[#allocation8] sm:$0xff] %v292_v30  ;;  %v295_v33 = vadd.f32 %v328_v28, %v294_v32  ;;  %v394_v34 = vpop.f32.mrb[3].mxu1 }
 0x20c   :  { %299 = vst [vmem:[#allocation8 + $0x8] sm:$0xff] %v295_v33 }
 0x20d   :  { %499 = shalt.err (!%p496_p0)
}
 0x20e   :  { %s500_s10 = scalar_lea.hbm %s631_s5, 256 }
 0x20f   :  { %p501_p1 = scmp.ne.s32.totalorder %s631_s5, %s500_s10  ;;  %p504_p2 = scmp.lt.u32.totalorder %s500_s10, %s631_s5 }
 0x211   :  { %p506_p3 = pnand %p504_p2, %p501_p1 }
 0x213   :  { %509 = shalt.err (!%p506_p3)
}
 0x214   :  { %s524_s15 = smov 128   ;;  %s525_s16 = smov 8  }
 0x215   :  { %311 = dma.vmem_to_hbm [thread:$0]  %s306_s8, 256, %s631_s5, [#allocation4], %s524_s15, %s524_s15, %s525_s16  }
 0x216   :  { %514 = dma.done.wait [#allocation4], 256  }
 0x217   :  { %515 = vsyncadd [#allocation4], 4294967040 }
 0x218   :  { %315 = vsyncpa [#allocation3], 1 }
 0x219   :  { %316 = vsyncpa [#allocation6], 1 }
 0x21a   :  { %317 = vsyncpa [#allocation4], 1 }

</bundles_post_ra>
